<compile_context>
chip_gen: v5e
topology: v5e:2x2
jax: 0.10.0
libtpu: 0.0.40
codegen_flags: <defaults>
</compile_context>

<pallas_src>
import functools
import math

import numpy as np
import jax
import jax.numpy as jnp
from jax.experimental import pallas as pl
from jax.experimental.pallas import tpu as pltpu

# ----------------------------------------------------------------------------
# EISANI "global" configuration flags (synthetic, deterministic)
# ----------------------------------------------------------------------------
useTabularDataset = True
useImageDataset = False
useNLPDataset = False
recursiveLayers = False
recursiveSuperblocksNumber = 1
EISANITABcontinuousVarEncodingNumBits = 8
numberOfSegmentsPerNeuron = 1          # single dendritic segment per neuron
segmentActivationThreshold = 3.0       # neuron fires if weighted input sum >= threshold


def generateNumberHiddenLayers(numberOfLayers: int, numberOfConvlayers: int) -> int:
    if useTabularDataset:
        return numberOfLayers - 1
    elif useImageDataset:
        return (numberOfLayers - numberOfConvlayers) - 1
    else:  # useNLPDataset
        return numberOfLayers - 1


def getNumberUniqueHiddenLayers(recursive, superblocks, numberOfHiddenLayers):
    if recursive:
        return superblocks * 2
    return numberOfHiddenLayers


class EISANIconfig:
    def __init__(self, batchSize, numberOfLayers, numberOfConvlayers, hiddenLayerSize,
                 inputLayerSize, outputLayerSize, numberOfFeatures, numberOfClasses,
                 numberOfSynapsesPerSegment, fieldTypeList):
        self.batchSize = batchSize
        self.numberOfLayers = numberOfLayers
        self.numberOfConvlayers = numberOfConvlayers
        self.hiddenLayerSize = hiddenLayerSize
        self.inputLayerSize = inputLayerSize
        self.outputLayerSize = outputLayerSize
        self.numberOfFeatures = numberOfFeatures
        self.numberOfClasses = numberOfClasses
        self.numberOfSynapsesPerSegment = numberOfSynapsesPerSegment
        self.numberOfHiddenLayers = generateNumberHiddenLayers(numberOfLayers, numberOfConvlayers)
        self.fieldTypeList = fieldTypeList


class Loss:
    def __init__(self, value=0.0):
        self._value = value

    def item(self):
        return self._value


# ----------------------------------------------------------------------------
# Hardware / tiling helpers
# ----------------------------------------------------------------------------
def _round_up(x: int, m: int) -> int:
    return ((x + m - 1) // m) * m


def _tpu_generation() -> int:
    try:
        kind = jax.devices()[0].device_kind.lower()
    except Exception:
        return 0
    for g in (7, 6, 5, 4):
        if f"v{g}" in kind:
            return g
    return 0


def _vmem_capacity_bytes() -> int:
    try:
        return int(pltpu.get_tpu_info().vmem_capacity_bytes)
    except Exception:
        return 64 * 1024 * 1024   # conservative default (v7x physical VMEM)


def _select_tiles(h_pad: int, p_max: int, c_pad: int, w_bytes: int, gen: int,
                  vmem_capacity: int):
    """Pick (batch tile, hidden tile): biggest tiles whose double-buffered weight /
    output-connection windows plus resident ping-pong activations + accumulator fit
    comfortably inside this generation's VMEM."""
    budget = int(0.70 * vmem_capacity)
    bt_target = 512 if gen == 6 else 256          # bigger batch tile amortizes the W stream
    tn_candidates = [t for t in (1024, 512, 256, 128) if h_pad % t == 0] or [h_pad]
    for bt in range(bt_target, 127, -128):
        for tn in tn_candidates:
            est = (2 * p_max * tn * w_bytes       # W window (double-buffered)
                   + 2 * tn * c_pad * 2           # oc window bf16 (double-buffered)
                   + 2 * bt * p_max * w_bytes     # ping-pong activation scratch
                   + 2 * bt * c_pad * 4)          # output accumulator window (f32)
            if est <= budget:
                return bt, tn
    return 128, tn_candidates[-1]


# ----------------------------------------------------------------------------
# Fused Pallas kernel: all hidden layers + output accumulation
# ----------------------------------------------------------------------------
def _fused_forward_kernel(init_hbm, w_ref, oc_ref, out_ref, act_buf, *,
                          threshold, tn, bt, integer_path, act_dtype):
    """Grid = (batch_tiles, L, hidden_tiles).  For batch tile b, layer l, hidden tile n:
         z    = act @ W[l][:, n*tn:(n+1)*tn]          (int8 x int8 -> i32, or bf16 -> f32 MXU)
         fire = (z >= threshold)                      ({0,1})
         out += fire @ outConn[l][n*tn:(n+1)*tn, :]   (bf16 x bf16 -> f32, resident accumulator)
       Ping-pong activations: layer l reads act_buf[l%2] and writes act_buf[(l+1)%2]."""
    b = pl.program_id(0)
    l = pl.program_id(1)
    n = pl.program_id(2)

    # Start of a batch tile: zero the resident output accumulator, zero the "odd" ping-pong
    # buffer (layer 1 reads its padded columns; they must at least be finite), and DMA this
    # batch tile's encoded input from HBM straight into ping-pong buffer 0.
    @pl.when(jnp.logical_and(l == 0, n == 0))
    def _():
        out_ref[...] = jnp.zeros_like(out_ref)
        act_buf[1] = jnp.zeros(act_buf.shape[1:], dtype=act_buf.dtype)
        row = pl.multiple_of(b * bt, 128)
        pltpu.sync_copy(init_hbm.at[pl.ds(row, bt)], act_buf.at[0])

    cur = jax.lax.rem(l, 2)     # layer l reads buffer (l % 2) ...
    nxt = 1 - cur               # ... and writes its activations into the other one.

    acc_dtype = jnp.int32 if integer_path else jnp.float32
    z = jnp.dot(act_buf[cur], w_ref[0], preferred_element_type=acc_dtype)   # (bt, tn)

    if integer_path:
        fire = z >= int(math.ceil(threshold))   # z is an exact integer synapse sum
    else:
        fire = z >= threshold

    # Output contribution: fire is exactly {0,1} and output connections are small integer
    # counts, so bf16 operands with f32 accumulation are exact.
    out_ref[...] += jnp.dot(fire.astype(jnp.bfloat16), oc_ref[0],
                            preferred_element_type=jnp.float32)

    # Ping-pong write of this tile of the next layer's input activations. Columns of the
    # next buffer in [H_pad, P_max) are never written here; every later layer's weight rows
    # >= H are zero-padded (guaranteed in _build_stacks), so those finite stale columns
    # contribute nothing to any later matmul.
    col = pl.multiple_of(n * tn, 128)
    act_buf[nxt, :, pl.ds(col, tn)] = fire.astype(act_dtype)


def eisani_fused_forward(init_act, w_stack, oc_stack, *, threshold, tn, bt, vmem_capacity):
    """init_act: (B_pad, P_max) {0,1} in the MXU dtype; w_stack: (L, P_max, H_pad) {-1,0,+1};
       oc_stack: (L, H_pad, C_pad) bf16. Returns (B_pad, C_pad) f32 output activations."""
    L, p_max, h_pad = w_stack.shape
    c_pad = oc_stack.shape[2]
    b_pad = init_act.shape[0]
    nt = h_pad // tn
    n_btiles = b_pad // bt
    integer_path = (np.dtype(w_stack.dtype) == np.dtype(np.int8))
    act_dtype = init_act.dtype
    w_bytes = np.dtype(w_stack.dtype).itemsize
    act_bytes = np.dtype(act_dtype).itemsize

    flops = 2 * L * b_pad * p_max * h_pad + 2 * L * b_pad * h_pad * c_pad
    bytes_accessed = (n_btiles * (w_stack.size * w_bytes + oc_stack.size * 2)
                      + init_act.size * act_bytes + b_pad * c_pad * 4)

    # VMEM footprint: W / oc windows are double-buffered by the pipeline; ping-pong
    # activations + (double-buffered) output window are resident; the encoded input stays
    # in HBM (pl.ANY), so it contributes no VMEM window.
    vmem_est = (2 * p_max * tn * w_bytes
                + 2 * tn * c_pad * 2
                + 2 * bt * p_max * act_bytes
                + 2 * bt * c_pad * 4)
    # ALWAYS set an explicit scoped-VMEM limit (v5e defaults to only 16 MiB), capped safely
    # below this generation's physical VMEM (64 MiB on v7x, 128 MiB on v5e/v6e).
    vmem_limit = min(int(0.92 * vmem_capacity),
                     max(int(1.5 * vmem_est) + (8 << 20), 32 << 20))

    kernel = functools.partial(_fused_forward_kernel, threshold=threshold, tn=tn, bt=bt,
                               integer_path=integer_path, act_dtype=act_dtype)
    return pl.pallas_call(
        kernel,
        out_shape=jax.ShapeDtypeStruct((b_pad, c_pad), jnp.float32),
        grid_spec=pltpu.PrefetchScalarGridSpec(
            num_scalar_prefetch=0,
            grid=(n_btiles, L, nt),
            in_specs=[
                # encoded input: left in HBM, manually DMA'd once per batch tile into the
                # ping-pong buffer (saves the default double-buffered input window).
                pl.BlockSpec(memory_space=pl.ANY),
                # hidden weights: one (P_max, tn) slab streamed (double-buffered) per step
                pl.BlockSpec((1, p_max, tn), lambda b, l, n: (l, 0, n)),
                # output connections: matching (tn, C_pad) slab per step
                pl.BlockSpec((1, tn, c_pad), lambda b, l, n: (l, n, 0)),
            ],
            # constant block index across (l, n) -> resident (bt, C_pad) accumulator per batch tile
            out_specs=pl.BlockSpec((bt, c_pad), lambda b, l, n: (b, 0)),
            scratch_shapes=[pltpu.VMEM((2, bt, p_max), act_dtype)],  # ping-pong activations
        ),
        compiler_params=pltpu.CompilerParams(
            # batch tiles are independent -> "parallel" lets v7x's 2 TensorCores split them;
            # the layer / hidden-tile axes carry the accumulator & activation chain.
            dimension_semantics=("parallel", "arbitrary", "arbitrary"),
            vmem_limit_bytes=int(vmem_limit),
        ),
        cost_estimate=pl.CostEstimate(flops=int(flops), transcendentals=0,
                                      bytes_accessed=int(bytes_accessed)),
    )(init_act, w_stack, oc_stack)


# ----------------------------------------------------------------------------
# Glue: encoding, parameter initialisation, pure-JAX reference (plain JAX)
# ----------------------------------------------------------------------------
def continuous_var_encoding(x, num_bits):
    """Thermometer encoding of x in [0,1]: (B, F) -> (B, F*num_bits) binary float32."""
    thresholds = (jnp.arange(num_bits, dtype=jnp.float32) + 1.0) / float(num_bits)
    bits = (x[..., None] >= thresholds).astype(jnp.float32)  # (B, F, num_bits)
    return bits.reshape(x.shape[0], -1)


def init_hidden_weights(key, num_neurons, prev_size, k):
    """Dense int8 matrix (num_neurons, prev_size): k random synapses per neuron, random +/-1."""
    keys = jax.random.split(key, num_neurons)

    def one_row(kk):
        k1, k2 = jax.random.split(kk)
        syn_idx = jax.random.permutation(k1, prev_size)[:k]
        signs = (jax.random.randint(k2, (k,), 0, 2) * 2 - 1).astype(jnp.int8)
        row = jnp.zeros((prev_size,), dtype=jnp.int8)
        return row.at[syn_idx].set(signs)

    return jax.vmap(one_row)(keys)


def eisani_reference(x, hidden_ws, oc_ws, num_bits, threshold):
    """Pure-JAX f32 reference of the summation-SANI forward pass (unpadded)."""
    act = continuous_var_encoding(x, num_bits)
    out = jnp.zeros((x.shape[0], oc_ws[0].shape[1]), jnp.float32)
    for w, oc in zip(hidden_ws, oc_ws):
        z = act @ w.astype(jnp.float32).T
        act = (z >= threshold).astype(jnp.float32)
        out = out + act @ oc
    return out


class EISANImodelPallas:
    """Pallas/JAX re-implementation of EISANImodel.forward (inference path, tabular config)."""

    def __init__(self, config: EISANIconfig, key):
        self.config = config
        self.numberUniqueHiddenLayers = getNumberUniqueHiddenLayers(
            recursiveLayers, recursiveSuperblocksNumber, config.numberOfHiddenLayers)
        self.encodedFeatureSize = config.numberOfFeatures * EISANITABcontinuousVarEncodingNumBits

        H = config.hiddenLayerSize
        C = config.numberOfClasses
        L = self.numberUniqueHiddenLayers

        gen = _tpu_generation()
        self.vmem_capacity = _vmem_capacity_bytes()
        # 256-wide MXU parts (v6e/v7x) want 256-aligned K/N; v5e's 128-wide MXU is fine at 128.
        gran = 256 if gen in (6, 7) else 128
        # v5e/v6e MXUs have a native int8 path -> halve the dominant W HBM stream. v7x has no
        # integer MXU path -> bf16 (exact for {-1,0,+1}).
        # TODO(synk): float8_e4m3 weights on v7x and int4-packed weights on v6e would shrink
        # the W stream further; left out pending hardware validation.
        self.mxu_dtype = jnp.int8 if gen in (5, 6) else jnp.bfloat16

        self.h_pad = _round_up(max(H, gran), gran)
        self.c_pad = _round_up(max(C, 128), 128)
        self.p_max = max(_round_up(self.encodedFeatureSize, gran), self.h_pad)
        w_bytes = np.dtype(self.mxu_dtype).itemsize
        self.bt_target, self.tn = _select_tiles(self.h_pad, self.p_max, self.c_pad,
                                                w_bytes, gen, self.vmem_capacity)

        keys = jax.random.split(key, L + 1)

        # Hidden connection matrices: int8 {-1,0,+1}, numberOfSynapsesPerSegment per neuron
        # (numberOfSegmentsPerNeuron == 1). Kept unpadded for parity with the PyTorch module.
        self.hiddenConnectionMatrix = []
        prevSize = self.encodedFeatureSize
        for l in range(L):
            w = init_hidden_weights(keys[l], H, prevSize, config.numberOfSynapsesPerSegment)
            self.hiddenConnectionMatrix.append(w)
            prevSize = H

        # Output connection matrices (H, C). PyTorch initialises these to zeros and grows
        # them as integer-like counts during training; here they are deterministic random
        # small integer counts so the inference argmax is non-trivial AND bf16 is exact.
        okeys = jax.random.split(keys[-1], L)
        self.outputConnectionMatrix = [
            jax.random.randint(okeys[l], (H, C), 0, 8).astype(jnp.float32) for l in range(L)
        ]

        self._stack_cache = {}

    def _build_stacks(self, mxu_dtype):
        """Pre-transpose, zero-pad and cast the parameter stacks once per MXU dtype."""
        cache_key = np.dtype(mxu_dtype).name
        if cache_key in self._stack_cache:
            return self._stack_cache[cache_key]
        H = self.config.hiddenLayerSize
        C = self.config.numberOfClasses
        # TODO(synk): layer 0 streams (P_max - enc_pad) all-zero K rows whenever
        # H >> encodedFeatureSize; per-layer K trimming (ragged stack + scalar-prefetched
        # K-tile counts) would remove that wasted HBM/MXU work.
        w_padded = []
        prevSize = self.encodedFeatureSize
        for w in self.hiddenConnectionMatrix:
            wt = jnp.zeros((self.p_max, self.h_pad), dtype=mxu_dtype)
            # rows >= prevSize and cols >= H stay exactly zero: this is what makes the stale
            # padded activation columns in the kernel's ping-pong buffers harmless.
            wt = wt.at[:prevSize, :H].set(w.T.astype(mxu_dtype))   # {-1,0,+1} exact
            w_padded.append(wt)
            prevSize = H
        w_stack = jnp.stack(w_padded, axis=0)                      # (L, P_max, H_pad)

        oc_padded = []
        for oc in self.outputConnectionMatrix:
            ocp = jnp.zeros((self.h_pad, self.c_pad), dtype=jnp.bfloat16)
            ocp = ocp.at[:H, :C].set(oc.astype(jnp.bfloat16))      # integer counts: exact
            oc_padded.append(ocp)
        oc_stack = jnp.stack(oc_padded, axis=0)                    # (L, H_pad, C_pad) bf16

        self._stack_cache[cache_key] = (w_stack, oc_stack)
        return w_stack, oc_stack

    def forward(self, trainOrTest, x, y=None):
        # numSubsamples == 1 for tabular datasets
        enc = continuous_var_encoding(x, EISANITABcontinuousVarEncodingNumBits)  # (B, enc) {0,1}
        B = enc.shape[0]
        bt = min(self.bt_target, max(128, _round_up(B, 128)))
        b_pad = _round_up(max(B, bt), bt)   # padded rows are zeros -> never fire -> no effect

        # Generation-preferred narrow dtype first, bf16 as a guaranteed fallback
        # (all values are exactly representable in every candidate dtype).
        candidates = [self.mxu_dtype]
        if np.dtype(self.mxu_dtype) != np.dtype(jnp.bfloat16):
            candidates.append(jnp.bfloat16)

        out_padded, last_err = None, None
        for dt in candidates:
            try:
                w_stack, oc_stack = self._build_stacks(dt)
                init = jnp.zeros((b_pad, self.p_max), dtype=dt)
                init = init.at[:B, :self.encodedFeatureSize].set(enc.astype(dt))
                out_padded = eisani_fused_forward(
                    init, w_stack, oc_stack,
                    threshold=segmentActivationThreshold, tn=self.tn, bt=bt,
                    vmem_capacity=self.vmem_capacity)
                out_padded = jax.block_until_ready(out_padded)
                self.mxu_dtype = dt          # remember the dtype that compiled & ran
                break
            except Exception as err:         # lowering / runtime failure -> bf16 fallback
                out_padded, last_err = None, err
        if out_padded is None:
            raise last_err

        output_activations = out_padded[:B, :self.config.numberOfClasses]        # (B, C)
        predictions = jnp.argmax(output_activations, axis=1)
        accuracy = None
        if y is not None:
            accuracy = jnp.mean((predictions == y).astype(jnp.float32))
        loss = Loss(0.0)
        # TODO(synk): training-mode output-connection updates, dynamic hidden-connection growth,
        # uniqueness checks, sequential-SANI / NLP / image-CNN branches and post-train pruning
        # are stateful host-side logic with no clean Pallas equivalent; not implemented here.
        return loss, accuracy, predictions, output_activations


# ----------------------------------------------------------------------------
# Demo
# ----------------------------------------------------------------------------
if __name__ == "__main__":
    key = jax.random.PRNGKey(0)
    k_model, k_x, k_y = jax.random.split(key, 3)

    batchSize = 2
    numberOfFeatures = 4
    numberOfClasses = 4
    hiddenLayerSize = 128
    numberOfLayers = 3          # -> 2 hidden layers (tabular)
    numberOfSynapsesPerSegment = 8

    config = EISANIconfig(
        batchSize=batchSize,
        numberOfLayers=numberOfLayers,
        numberOfConvlayers=0,
        hiddenLayerSize=hiddenLayerSize,
        inputLayerSize=numberOfFeatures * EISANITABcontinuousVarEncodingNumBits,
        outputLayerSize=numberOfClasses,
        numberOfFeatures=numberOfFeatures,
        numberOfClasses=numberOfClasses,
        numberOfSynapsesPerSegment=numberOfSynapsesPerSegment,
        fieldTypeList=[],
    )

    model = EISANImodelPallas(config, k_model)

    x = jax.random.uniform(k_x, (batchSize, numberOfFeatures), dtype=jnp.float32)
    y = jax.random.randint(k_y, (batchSize,), 0, numberOfClasses, dtype=jnp.int32)

    loss, accuracy, predictions, output_activations = model.forward(False, x, y)
    jax.block_until_ready(output_activations)
    jax.block_until_ready(accuracy)

    # Pure-JAX reference check (exact: all values are small integers, f32 accumulation).
    ref = eisani_reference(x, model.hiddenConnectionMatrix, model.outputConnectionMatrix,
                           EISANITABcontinuousVarEncodingNumBits, segmentActivationThreshold)
    np.testing.assert_allclose(np.asarray(output_activations), np.asarray(ref),
                               rtol=1e-3, atol=1e-3)

    print("KERNEL_OK")
</pallas_src>

<mosaic_0001>
module attributes {stable_mosaic.version = 11 : i64} {
  func.func @_fused_forward_kernel(%arg0: i32, %arg1: i32, %arg2: i32, %arg3: memref<128x128xbf16, #tpu.memory_space<any>>, %arg4: memref<1x128x128xbf16, #tpu.memory_space<vmem>>, %arg5: memref<1x128x128xbf16, #tpu.memory_space<vmem>>, %arg6: memref<128x128xf32, #tpu.memory_space<vmem>>, %arg7: memref<2x128x128xbf16, #tpu.memory_space<vmem>>) attributes {dimension_semantics = [#tpu.dimension_semantics<parallel>, #tpu.dimension_semantics<arbitrary>, #tpu.dimension_semantics<arbitrary>], iteration_bounds = array<i64: 1, 2, 1>, scalar_prefetch = 0 : i64, scratch_operands = 1 : i64, tpu.core_type = #tpu.core_type<tc>, window_params = [{}, {transform_indices = @transform_1, window_bounds = array<i64: 1, 128, 128>}, {transform_indices = @transform_2, window_bounds = array<i64: 1, 128, 128>}, {transform_indices = @transform_3, window_bounds = array<i64: 128, 128>}]} {
    %c0_i32 = arith.constant 0 : i32
    %0 = arith.cmpi eq, %arg1, %c0_i32 : i32
    %c0_i32_0 = arith.constant 0 : i32
    %1 = arith.cmpi eq, %arg2, %c0_i32_0 : i32
    %2 = arith.andi %0, %1 : i1
    %3 = arith.extui %2 : i1 to i32
    %c0_i32_1 = arith.constant 0 : i32
    %4 = arith.cmpi ne, %3, %c0_i32_1 : i32
    scf.if %4 {
      %cst_16 = arith.constant 0.000000e+00 : f32
      %34 = vector.broadcast %cst_16 : f32 to vector<128x128xf32>
      %c0_17 = arith.constant 0 : index
      %c0_18 = arith.constant 0 : index
      %35 = vector.load %arg6[%c0_17, %c0_18] : memref<128x128xf32, #tpu.memory_space<vmem>>, vector<128x128xf32>
      tpu.vector_store %arg6[%c0_17, %c0_18], %34 {strides = array<i32>} : memref<128x128xf32, #tpu.memory_space<vmem>>, vector<128x128xf32>,
      %cst_19 = arith.constant 0.000000e+00 : bf16
      %36 = vector.broadcast %cst_19 : bf16 to vector<128x128xbf16>
      %c1 = arith.constant 1 : index
      %c0_20 = arith.constant 0 : index
      %c0_21 = arith.constant 0 : index
      %37 = vector.load %arg7[%c1, %c0_20, %c0_21] : memref<2x128x128xbf16, #tpu.memory_space<vmem>>, vector<1x128x128xbf16>
      %38 = vector.shape_cast %37 : vector<1x128x128xbf16> to vector<128x128xbf16>
      %39 = vector.shape_cast %36 : vector<128x128xbf16> to vector<1x128x128xbf16>
      tpu.vector_store %arg7[%c1, %c0_20, %c0_21], %39 {strides = array<i32>} : memref<2x128x128xbf16, #tpu.memory_space<vmem>>, vector<1x128x128xbf16>,
      %c128_i32_22 = arith.constant 128 : i32
      %40 = arith.muli %arg0, %c128_i32_22 : i32
      %41 = tpu.assume_multiple %40, 128 : i32
      %c0_i32_23 = arith.constant 0 : i32
      "tpu.region"() ({
        %42 = tpu.sem_alloc : memref<!tpu.dma_semaphore, #tpu.memory_space<semaphore_mem>>
        %c0_i32_24 = arith.constant 0 : i32
        %43 = tpu.memref_slice %arg3[%41, %c0_i32_24] : memref<128x128xbf16, #tpu.memory_space<any>> -> memref<128x128xbf16, #tpu.memory_space<any>>
        %c0_i32_25 = arith.constant 0 : i32
        %c0_i32_26 = arith.constant 0 : i32
        %44 = tpu.memref_slice %arg7[%c0_i32_23, %c0_i32_25, %c0_i32_26] : memref<2x128x128xbf16, #tpu.memory_space<vmem>> -> memref<1x128x128xbf16, #tpu.memory_space<vmem>>
        %45 = tpu.memref_squeeze %44 : memref<1x128x128xbf16, #tpu.memory_space<vmem>> -> memref<128x128xbf16, #tpu.memory_space<vmem>>
        tpu.enqueue_dma source(%43 : memref<128x128xbf16, #tpu.memory_space<any>>) target(%45 : memref<128x128xbf16, #tpu.memory_space<vmem>>) target_semaphore(%42 : memref<!tpu.dma_semaphore, #tpu.memory_space<semaphore_mem>>)
        %c0_i32_27 = arith.constant 0 : i32
        %46 = tpu.memref_slice %arg3[%41, %c0_i32_27] : memref<128x128xbf16, #tpu.memory_space<any>> -> memref<128x128xbf16, #tpu.memory_space<any>>
        %c0_i32_28 = arith.constant 0 : i32
        %c0_i32_29 = arith.constant 0 : i32
        %47 = tpu.memref_slice %arg7[%c0_i32_23, %c0_i32_28, %c0_i32_29] : memref<2x128x128xbf16, #tpu.memory_space<vmem>> -> memref<1x128x128xbf16, #tpu.memory_space<vmem>>
        %48 = tpu.memref_squeeze %47 : memref<1x128x128xbf16, #tpu.memory_space<vmem>> -> memref<128x128xbf16, #tpu.memory_space<vmem>>
        tpu.wait_dma2 semaphore(%42 : memref<!tpu.dma_semaphore, #tpu.memory_space<semaphore_mem>>) src(%46 : memref<128x128xbf16, #tpu.memory_space<any>>) dst(%48 : memref<128x128xbf16, #tpu.memory_space<vmem>>)
        tpu.yield
      }) : () -> ()
    } else {
    }
    %c2_i32 = arith.constant 2 : i32
    %5 = arith.remsi %arg1, %c2_i32 : i32
    %c1_i32 = arith.constant 1 : i32
    %6 = arith.subi %c1_i32, %5 : i32
    %7 = arith.index_cast %5 : i32 to index
    %c0 = arith.constant 0 : index
    %c0_2 = arith.constant 0 : index
    %8 = vector.load %arg7[%7, %c0, %c0_2] : memref<2x128x128xbf16, #tpu.memory_space<vmem>>, vector<1x128x128xbf16>
    %9 = vector.shape_cast %8 : vector<1x128x128xbf16> to vector<128x128xbf16>
    %c0_3 = arith.constant 0 : index
    %c0_4 = arith.constant 0 : index
    %c0_5 = arith.constant 0 : index
    %10 = vector.load %arg4[%c0_3, %c0_4, %c0_5] : memref<1x128x128xbf16, #tpu.memory_space<vmem>>, vector<1x128x128xbf16>
    %11 = vector.shape_cast %10 : vector<1x128x128xbf16> to vector<128x128xbf16>
    %cst = arith.constant dense<0.000000e+00> : vector<128x128xf32>
    %12 = tpu.matmul %9, %11, %cst {dimension_numbers = #tpu.dot_dimension_numbers<[1], [0], [0], [1], [0, 0, 1, 1], [], []>} : vector<128x128xbf16>, vector<128x128xbf16>, vector<128x128xf32> -> vector<128x128xf32>
    %cst_6 = arith.constant 3.000000e+00 : f32
    %13 = vector.broadcast %cst_6 : f32 to vector<128x128xf32>
    %14 = arith.cmpf oge, %12, %13 : vector<128x128xf32>
    %c0_7 = arith.constant 0 : index
    %c0_8 = arith.constant 0 : index
    %15 = vector.load %arg6[%c0_7, %c0_8] : memref<128x128xf32, #tpu.memory_space<vmem>>, vector<128x128xf32>
    %16 = arith.extui %14 : vector<128x128xi1> to vector<128x128xi32>
    %17 = arith.sitofp %16 : vector<128x128xi32> to vector<128x128xf32>
    %18 = arith.truncf %17 : vector<128x128xf32> to vector<128x128xbf16>
    %c0_9 = arith.constant 0 : index
    %c0_10 = arith.constant 0 : index
    %c0_11 = arith.constant 0 : index
    %19 = vector.load %arg5[%c0_9, %c0_10, %c0_11] : memref<1x128x128xbf16, #tpu.memory_space<vmem>>, vector<1x128x128xbf16>
    %20 = vector.shape_cast %19 : vector<1x128x128xbf16> to vector<128x128xbf16>
    %cst_12 = arith.constant dense<0.000000e+00> : vector<128x128xf32>
    %21 = tpu.matmul %18, %20, %cst_12 {dimension_numbers = #tpu.dot_dimension_numbers<[1], [0], [0], [1], [0, 0, 1, 1], [], []>} : vector<128x128xbf16>, vector<128x128xbf16>, vector<128x128xf32> -> vector<128x128xf32>
    %22 = arith.addf %15, %21 : vector<128x128xf32>
    %c0_13 = arith.constant 0 : index
    %c0_14 = arith.constant 0 : index
    %23 = vector.load %arg6[%c0_13, %c0_14] : memref<128x128xf32, #tpu.memory_space<vmem>>, vector<128x128xf32>
    tpu.vector_store %arg6[%c0_13, %c0_14], %22 {strides = array<i32>} : memref<128x128xf32, #tpu.memory_space<vmem>>, vector<128x128xf32>,
    %c128_i32 = arith.constant 128 : i32
    %24 = arith.muli %arg2, %c128_i32 : i32
    %25 = tpu.assume_multiple %24, 128 : i32
    %26 = arith.extui %14 : vector<128x128xi1> to vector<128x128xi32>
    %27 = arith.sitofp %26 : vector<128x128xi32> to vector<128x128xf32>
    %28 = arith.truncf %27 : vector<128x128xf32> to vector<128x128xbf16>
    %29 = arith.index_cast %6 : i32 to index
    %c0_15 = arith.constant 0 : index
    %30 = arith.index_cast %25 : i32 to index
    %31 = vector.load %arg7[%29, %c0_15, %30] : memref<2x128x128xbf16, #tpu.memory_space<vmem>>, vector<1x128x128xbf16>
    %32 = vector.shape_cast %31 : vector<1x128x128xbf16> to vector<128x128xbf16>
    %33 = vector.shape_cast %28 : vector<128x128xbf16> to vector<1x128x128xbf16>
    tpu.vector_store %arg7[%29, %c0_15, %30], %33 {strides = array<i32>} : memref<2x128x128xbf16, #tpu.memory_space<vmem>>, vector<1x128x128xbf16>,
    return
  }
  func.func @transform_1(%arg0: i32, %arg1: i32, %arg2: i32) -> (i32, i32, i32) {
    %c0_i32 = arith.constant 0 : i32
    %c0_i32_0 = arith.constant 0 : i32
    return %arg1, %c0_i32, %arg2 : i32, i32, i32
  }
  func.func @transform_2(%arg0: i32, %arg1: i32, %arg2: i32) -> (i32, i32, i32) {
    %c0_i32 = arith.constant 0 : i32
    %c0_i32_0 = arith.constant 0 : i32
    return %arg1, %arg2, %c0_i32 : i32, i32, i32
  }
  func.func @transform_3(%arg0: i32, %arg1: i32, %arg2: i32) -> (i32, i32) {
    %c0_i32 = arith.constant 0 : i32
    %c0_i32_0 = arith.constant 0 : i32
    return %arg0, %c0_i32 : i32, i32
  }
}

</mosaic_0001>

<bundles_post_ra>
// kernel: tpu_custom_call.1
= control target key start
LH: loop header
LB: loop body
LE: loop exit
PB: predicated region body
PF: predicated region fallthrough
CT: control target
= control target key end

     0   :  { %8 = vsyncpa [#allocation4], 0  ;;  %s1542_s0 = inlined_call_operand.hbm [shape: bf16[128,128], index: 0, kind: input, shape index: {}]   ;;  %s1543_s1 = inlined_call_operand.hbm [shape: bf16[2,128,128], index: 1, kind: input, shape index: {}]   ;;  %s1544_s2 = inlined_call_operand.hbm [shape: bf16[2,128,128], index: 2, kind: input, shape index: {}]   ;;  %s1545_s3 = inlined_call_operand.hbm [shape: f32[128,128], index: 3, kind: output, shape index: {}]  }
   0x1   :  { %10 = vsyncpa [#allocation4 + $0x1], 0 }
   0x2   :  { %11 = vsyncpa [#allocation7], 0 }
   0x3   :  { %13 = vsyncpa [#allocation7 + $0x1], 0 }
   0x4   :  { %14 = vsyncpa [#allocation5], 0  ;;  %s1375_s12 = smov 0   ;;  %s1377_s13 = smov 0  }
   0x5   :  { %s1379_s14 = smov 0   ;;  %s1381_s15 = smov 0  }
   0x6   :  { %s1383_s16 = smov 0   ;;  %s1385_s17 = smov 0  }
   0x7 LB: > { %s1546_s18 = sadd.s32 4294967295, %s1344_s17   ;;  %s35_s19 = sadd.s32 1, %s1340_s16  ;;  %s1344_s17 = sphi %s1385_s17, %s20_s17   ;;  %s1340_s16 = sphi %s1383_s16, %s1555_s16   ;;  %s1336_s15 = sphi %s1381_s15, %s1554_s15   ;;  %s1332_s14 = sphi %s1379_s14, %s1553_s14   ;;  %s1328_s13 = sphi %s1377_s13, %s1552_s13   ;;  %s1324_s12 = sphi %s1375_s12, %s1551_s12  }
   0x8   : > { %p37_p0 = scmp.ge.s32.totalorder %s35_s19, 2  ;;  %s48_s20 = sadd.s32 1, %s1332_s14 }
   0x9   : > { %p55_p1 = scmp.ne.s32.totalorder %s1332_s14, %s1328_s13  ;;  %p56_p2 = scmp.eq.s32.totalorder %s1344_s17, 0 }
   0xa   : > { %s1557_s19 = smov (%p37_p0, %s35_s19), 0  ;;  %p61_p4 = scmp.ne.s32.totalorder %s1328_s13, %s1324_s12 }
   0xb   : > { %p1411_p3 = por %p56_p2, %p55_p1  ;;  %s43_s22 = ssub.s32 %s1340_s16, %s1557_s19 }
   0xc   : > { %p62_p5 = scmp.eq.s32.totalorder %s1546_s18, 0  ;;  %p46_p6 = scmp.eq.s32.totalorder %s43_s22, 0 }
   0xd   : > { %p1112_p8 = scmp.lt.s32.totalorder %s1344_s17, 2  ;;  %s1429_s25 = sand.u32 1, %s1332_s14  }
   0xe   : > { %p1420_p7 = por %p62_p5, %p61_p4  ;;  %s1021_s26 = sshll.u32 %s1340_s16, 6 }
   0xf   : > { %s1426_s24 = scalar_select %p46_p6, %s1332_s14, %s48_s20  }
  0x10   : > { %s890_s27 = sshll.u32 %s1429_s25, 6  ;;  %s149_s30 = scalar_lea.hbm %s1543_s1, %s1021_s26 }
  0x11   : > { %s150_s4 = sshll.u32 %s149_s30, 4  ;;  %s143_s5 = scalar_lea.vmem [#allocation3], %s890_s27  ;;  %s151_s4 = int_to_ptr.hbm [resolvable:$true] %s150_s4 }
  0x12   : > { %s152_s6 = sshll.u32 %s143_s5, 4  ;;  %p1438_p9 = pnand %p1112_p8, %p1411_p3  ;;  %s153_s6 = int_to_ptr.vmem [resolvable:$true] %s152_s6 }
  0x13   : > { %p896_p10 = scmp.ge.s32.totalorder %s1344_s17, 1  ;;  %p184_p11 = scmp.lt.s32.totalorder %s1344_s17, 3 }
  0x14   : > { %s140_s8 = scalar_lea.sflag [#allocation4], %s1429_s25  ;;  %s1346_s9 = smov 64  }
  0x15   : > { %s1347_s10 = smov 4   ;;  %p185_p12 = pnand %p896_p10, %p184_p11 }
  0x16   : > { %1108 = dma.hbm_to_vmem [thread:$0]  (!%p1438_p9), %s151_s4, 1024, %s153_s6, %s140_s8, %s1346_s9, %s1346_s9, %s1347_s10  }
  0x17   : > { %s173_s20 = scalar_lea.hbm %s1544_s2, %s1021_s26  ;;  %s166_s21 = scalar_lea.vmem [#allocation6], %s890_s27 }
  0x18   : > { %s174_s22 = sshll.u32 %s173_s20, 4  ;;  %s176_s28 = sshll.u32 %s166_s21, 4  ;;  %s175_s22 = int_to_ptr.hbm [resolvable:$true] %s174_s22  ;;  %s177_s28 = int_to_ptr.vmem [resolvable:$true] %s176_s28 }
  0x19   : > { %s163_s29 = scalar_lea.sflag [#allocation7], %s1429_s25  ;;  %188 = sbr.rel (%p185_p12) target bundleno = 446 (0x1be), region = 28 }
  0x1a   : > { %1111 = dma.hbm_to_vmem [thread:$0]  (!%p1438_p9), %s175_s22, 1024, %s177_s28, %s163_s29, %s1346_s9, %s1346_s9, %s1347_s10  }
  0x1b   : > { %s190_s30 = sand.u32 (!%p185_p12), 1, %s1328_s13  }
  0x1c   : > { %s897_s5 = sshll.u32 (!%p185_p12), %s190_s30, 6  ;;  %s191_s18 = scalar_lea.sflag (!%p185_p12), [#allocation4], %s190_s30 }
  0x1d   : > { %s1454_s4 = scalar_lea.vmem (!%p185_p12), [#allocation3], %s897_s5 }
  0x1e   : > { %1309 = dma.done.wait (%p1420_p7), %s191_s18, 1024  }
  0x1f   : > { %1311 = vsyncadd (%p1420_p7), %s191_s18, 4294966272  ;;  %s201_s26 = scalar_lea.sflag [#allocation7], %s190_s30  ;;  %s1460_s27 = scalar_lea.vmem [#allocation6], %s897_s5 }
  0x20   : > { %1313 = dma.done.wait (%p1420_p7), %s201_s26, 1024  }
  0x21   : > { %1315 = vsyncadd (%p1420_p7), %s201_s26, 4294966272  ;;  %p229_p13 = scmp.eq.s32.totalorder %s1336_s15, 0 }
  0x22   : > { %v1348_v0 = vmov (%p229_p13), 0.0   ;;  %v1349_v1 = vmov (%p229_p13), 0  }
  0x23   : > { %234 = sbr.rel (!%p229_p13) target bundleno = 72 (0x48), region = 40  ;;  %235 = vst [vmem:[#allocation8] sm:$0xff] (%p229_p13), %v1348_v0 }
  0x24   : > { %236 = vst [vmem:[#allocation8 + $0x8] sm:$0xff] (%p229_p13), %v1348_v0 }
  0x25   : > { %237 = vst [vmem:[#allocation8 + $0x10] sm:$0xff] (%p229_p13), %v1348_v0 }
  0x26   : > { %238 = vst [vmem:[#allocation8 + $0x18] sm:$0xff] (%p229_p13), %v1348_v0 }
  0x27   : > { %239 = vst [vmem:[#allocation8 + $0x20] sm:$0xff] (%p229_p13), %v1348_v0 }
  0x28   : > { %240 = vst [vmem:[#allocation8 + $0x28] sm:$0xff] %v1348_v0 }
  0x29   : > { %241 = vst [vmem:[#allocation8 + $0x30] sm:$0xff] %v1348_v0 }
  0x2a   : > { %242 = vst [vmem:[#allocation8 + $0x38] sm:$0xff] %v1348_v0 }
  0x2b   : > { %243 = vst [vmem:[#allocation8 + $0x40] sm:$0xff] %v1348_v0 }
  0x2c   : > { %244 = vst [vmem:[#allocation8 + $0x48] sm:$0xff] %v1348_v0 }
  0x2d   : > { %245 = vst [vmem:[#allocation8 + $0x50] sm:$0xff] %v1348_v0 }
  0x2e   : > { %246 = vst [vmem:[#allocation8 + $0x58] sm:$0xff] %v1348_v0 }
  0x2f   : > { %247 = vst [vmem:[#allocation8 + $0x60] sm:$0xff] %v1348_v0 }
  0x30   : > { %248 = vst [vmem:[#allocation8 + $0x68] sm:$0xff] %v1348_v0 }
  0x31   : > { %249 = vst [vmem:[#allocation8 + $0x70] sm:$0xff] %v1348_v0 }
  0x32   : > { %250 = vst [vmem:[#allocation8 + $0x78] sm:$0xff] %v1348_v0 }
  0x33   : > { %252 = vst [vmem:[#allocation2 + $0x40] sm:$0xf] %v1349_v1 }
  0x34   : > { %253 = vst [vmem:[#allocation2 + $0x44] sm:$0xf] %v1349_v1 }
  0x35   : > { %254 = vst [vmem:[#allocation2 + $0x48] sm:$0xf] %v1349_v1 }
  0x36   : > { %255 = vst [vmem:[#allocation2 + $0x4c] sm:$0xf] %v1349_v1 }
  0x37   : > { %256 = vst [vmem:[#allocation2 + $0x50] sm:$0xf] %v1349_v1 }
  0x38   : > { %257 = vst [vmem:[#allocation2 + $0x54] sm:$0xf] %v1349_v1 }
  0x39   : > { %258 = vst [vmem:[#allocation2 + $0x58] sm:$0xf] %v1349_v1 }
  0x3a   : > { %259 = vst [vmem:[#allocation2 + $0x5c] sm:$0xf] %v1349_v1 }
  0x3b   : > { %260 = vst [vmem:[#allocation2 + $0x60] sm:$0xf] %v1349_v1 }
  0x3c   : > { %261 = vst [vmem:[#allocation2 + $0x64] sm:$0xf] %v1349_v1 }
  0x3d   : > { %262 = vst [vmem:[#allocation2 + $0x68] sm:$0xf] %v1349_v1 }
  0x3e   : > { %263 = vst [vmem:[#allocation2 + $0x6c] sm:$0xf] %v1349_v1 }
  0x3f   : > { %264 = vst [vmem:[#allocation2 + $0x70] sm:$0xf] %v1349_v1 }
  0x40   : > { %265 = vst [vmem:[#allocation2 + $0x74] sm:$0xf] %v1349_v1 }
  0x41   : > { %266 = vst [vmem:[#allocation2 + $0x78] sm:$0xf] %v1349_v1 }
  0x42   : > { %267 = vst [vmem:[#allocation2 + $0x7c] sm:$0xf] %v1349_v1 }
  0x43   : > { %s280_s25 = sshll.u32 %s1542_s0, 4  ;;  %s1350_s6 = smov [#allocation2]   ;;  %s281_s25 = int_to_ptr.hbm [resolvable:$true] %s280_s25 }
  0x44   : > { %s282_s7 = sshll.u32 %s1350_s6, 4  ;;  %s283_s7 = int_to_ptr.vmem [resolvable:$true] %s282_s7 }
  0x45   : > { %285 = dma.hbm_to_vmem [thread:$0]  %s281_s25, 1024, %s283_s7, [#allocation9] }
  0x46   : > { %1316 = dma.done.wait [#allocation9], 1024 }
  0x47   : > { %1317 = vsyncadd [#allocation9], 4294966272 }
  0x48 PF: > { %v1040_v2 = vld [vmem:[%s1454_s4 + $0x38] sm:$0xff]  ;;  %v1039_v3 = vld [vmem:[%s1454_s4 + $0x30] sm:$0xff]  ;;  %v1038_v4 = vld [vmem:[%s1454_s4 + $0x28] sm:$0xff]  ;;  %s291_s8 = ssub.s32 0, %s1336_s15  ;;  %p290_p0 = scmp.lt.s32.totalorder %s1336_s15, 0  ;;  %v1351_v27 = vmov 0.0  }
  0x49   : > { %428 = vmatpush.bf16.msra.mxu0 %v1040_v2  ;;  %1081 = vmatpush.bf16.msra.mxu2 %v1040_v2  ;;  %v1037_v5 = vld [vmem:[%s1454_s4 + $0x20] sm:$0xff]  ;;  %s900_s9 = smin.u32 %s1336_s15, %s291_s8  ;;  %v1036_v6 = vld [vmem:[%s1454_s4 + $0x18] sm:$0xff]  ;;  %v1035_v7 = vld [vmem:[%s1454_s4 + $0x10] sm:$0xff]  ;;  %s1352_s28 = smov [#allocation8]  }
  0x4a   : > { %s293_s10 = sand.u32 1, %s900_s9   ;;  %v1034_v8 = vld [vmem:[%s1454_s4 + $0x8] sm:$0xff]  ;;  %v1033_v9 = vld [vmem:[%s1454_s4] sm:$0xff]  ;;  %v1048_v14 = vld [vmem:[%s1460_s27 + $0x38] sm:$0xff]  ;;  %s781_s29 = sshll.u32 %s1352_s28, 4  ;;  %s782_s29 = int_to_ptr.vmem [resolvable:$true] %s781_s29 }
  0x4b   : > { %s294_s11 = ssub.s32 0, %s293_s10  ;;  %669 = vmatpush.bf16.msra.mxu1 %v1048_v14  ;;  %v1047_v15 = vld [vmem:[%s1460_s27 + $0x30] sm:$0xff]  ;;  %1089 = vmatpush.bf16.msra.mxu3 %v1048_v14  ;;  %v1046_v16 = vld [vmem:[%s1460_s27 + $0x28] sm:$0xff]  ;;  %v1045_v17 = vld [vmem:[%s1460_s27 + $0x20] sm:$0xff]  ;;  %s783_s4 = sshll.u32 %s1545_s3, 4  ;;  %s784_s4 = int_to_ptr.hbm [resolvable:$true] %s783_s4 }
  0x4c   : > { %s1559_s11 = smov (!%p290_p0, %s294_s11), %s293_s10  ;;  %v1044_v22 = vld [vmem:[%s1460_s27 + $0x18] sm:$0xff]  ;;  %v1043_v23 = vld [vmem:[%s1460_s27 + $0x10] sm:$0xff]  ;;  %v1042_v24 = vld [vmem:[%s1460_s27 + $0x8] sm:$0xff]  ;;  %s1550_s26 = sadd.s32 4294967295, %s1344_s17  }
  0x4d   : > { %429 = vmatpush.bf16.msra.mxu0 %v1039_v3  ;;  %1082 = vmatpush.bf16.msra.mxu2 %v1039_v3  ;;  %s1024_s12 = sshll.u32 %s1559_s11, 6  ;;  %v1041_v25 = vld [vmem:[%s1460_s27] sm:$0xff]  ;;  %s296_s15 = ssub.s32 1, %s1559_s11 }
  0x4e   : > { %s299_s20 = scalar_lea.vmem [#allocation2], %s1024_s12  ;;  %s1049_s22 = sshll.u32 %s296_s15, 6 }
  0x4f   : > { %v1025_v10 = vld [vmem:[%s299_s20] sm:$0xff]  ;;  %v1026_v12 = vld [vmem:[%s299_s20 + $0x8] sm:$0xff]  ;;  %670 = vmatpush.bf16.msra.mxu1 %v1047_v15  ;;  %1090 = vmatpush.bf16.msra.mxu3 %v1047_v15  ;;  %v1027_v18 = vld [vmem:[%s299_s20 + $0x10] sm:$0xff]  ;;  %s1496_s21 = scalar_lea.vmem [#allocation2], %s1049_s22  ;;  %p1113_p1 = scmp.eq.s32.totalorder %s1550_s26, 1 }
  0x50   : > { %v1029_v11 = vld [vmem:[%s299_s20 + $0x20] sm:$0xff]  ;;  %v1030_v13 = vld [vmem:[%s299_s20 + $0x28] sm:$0xff]  ;;  %v1031_v19 = vld [vmem:[%s299_s20 + $0x30] sm:$0xff]  ;;  %s1353_s27 = smov 128   ;;  %s1354_s18 = smov 8  }
  0x51   : > { %430 = vmatpush.bf16.msra.mxu0 %v1038_v4  ;;  %1083 = vmatpush.bf16.msra.mxu2 %v1038_v4  ;;  %v1028_v20 = vld [vmem:[%s299_s20 + $0x18] sm:$0xff] }
  0x52   : > { %v1032_v21 = vld [vmem:[%s299_s20 + $0x38] sm:$0xff] }
  0x53   : > { %671 = vmatpush.bf16.msra.mxu1 %v1046_v16  ;;  %1091 = vmatpush.bf16.msra.mxu3 %v1046_v16 }
  0x55   : > { %431 = vmatpush.bf16.msra.mxu0 %v1037_v5  ;;  %1084 = vmatpush.bf16.msra.mxu2 %v1037_v5 }
  0x57   : > { %672 = vmatpush.bf16.msra.mxu1 %v1045_v17  ;;  %1092 = vmatpush.bf16.msra.mxu3 %v1045_v17 }
  0x59   : > { %432 = vmatpush.bf16.msra.mxu0 %v1036_v6  ;;  %1085 = vmatpush.bf16.msra.mxu2 %v1036_v6 }
  0x5b   : > { %673 = vmatpush.bf16.msra.mxu1 %v1044_v22  ;;  %1093 = vmatpush.bf16.msra.mxu3 %v1044_v22 }
  0x5d   : > { %433 = vmatpush.bf16.msra.mxu0 %v1035_v7  ;;  %1086 = vmatpush.bf16.msra.mxu2 %v1035_v7 }
  0x5f   : > { %674 = vmatpush.bf16.msra.mxu1 %v1043_v23  ;;  %1094 = vmatpush.bf16.msra.mxu3 %v1043_v23 }
  0x61   : > { %434 = vmatpush.bf16.msra.mxu0 %v1034_v8  ;;  %1087 = vmatpush.bf16.msra.mxu2 %v1034_v8 }
  0x63   : > { %675 = vmatpush.bf16.msra.mxu1 %v1042_v24  ;;  %1095 = vmatpush.bf16.msra.mxu3 %v1042_v24 }
  0x65   : > { %435 = vmatpush.bf16.msra.mxu0 %v1033_v9  ;;  %1088 = vmatpush.bf16.msra.mxu2 %v1033_v9 }
  0x67   : > { %676 = vmatpush.bf16.msra.mxu1 %v1041_v25  ;;  %1096 = vmatpush.bf16.msra.mxu3 %v1041_v25 }
  0x68   : > { %436 = vmatmul.bf16.vlgmr.msra.gmra.mxu0 %v1025_v10  ;;  %456 = vmatmul.bf16.vlgmr.msra.gmra.mxu2 %v1029_v11 }
  0x78   : > { %441 = vmatmul.bf16.gmra.mxu0 %v1026_v12  ;;  %461 = vmatmul.bf16.gmra.mxu2 %v1030_v13 }
  0x88   : > { %446 = vmatmul.bf16.gmra.mxu0 %v1027_v18  ;;  %466 = vmatmul.bf16.gmra.mxu2 %v1031_v19 }
  0x98   : > { %451 = vmatmul.bf16.gmra.mxu0 %v1028_v20  ;;  %471 = vmatmul.bf16.gmra.mxu2 %v1032_v21 }
  0xe5   : > { %v437_v26 = vpop.f32.mrf.mxu0 }
  0xe6   : > { %vm477_vm0 = vcmp.ge.f32.partialorder %v437_v26, 3.0 }
  0xe7   : > { %v967_v28 = vsel %vm477_vm0, 1.0, %v1351_v27 }
  0xe8   : > { %v541_v30 = vpack.c.bf16 %v967_v28, %v967_v28 }
  0xea   : > { %v589_v33 = vunpack.c.l.b16 %v541_v30 }
  0xeb   : > { %v457_v29 = vpop.f32.mrf.mxu2 }
  0xec   : > { %vm485_vm1 = vcmp.ge.f32.partialorder %v457_v29, 3.0 }
  0xed   : > { %v439_v31 = vpop.f32.mrf.mxu0  ;;  %v975_v36 = vsel %vm485_vm1, 1.0, %v1351_v27 }
  0xee   : > { %vm478_vm2 = vcmp.ge.f32.partialorder %v439_v31, 3.0  ;;  %v549_v39 = vpack.c.bf16 %v975_v36, %v975_v36 }
  0xef   : > { %v968_v32 = vsel %vm478_vm2, 1.0, %v1351_v27 }
  0xf0   : > { %v542_v34 = vpack.c.bf16 %v968_v32, %v968_v32  ;;  %v1051_v35 = vpack.c.bf16 %v968_v32, %v967_v28  ;;  %v597_v45 = vunpack.c.l.b16 %v549_v39 }
  0xf2   : > { %v590_v37 = vunpack.c.l.b16 %v542_v34  ;;  %1052 = vst [vmem:[%s1496_s21] sm:$0xff] %v1051_v35  }
  0xf3   : > { %v459_v38 = vpop.f32.mrf.mxu2 }
  0xf4   : > { %vm486_vm3 = vcmp.ge.f32.partialorder %v459_v38, 3.0  ;;  %v605_v40 = vpack.c.b16 %v590_v37, %v589_v33 }
  0xf5   : > { %v976_v41 = vsel %vm486_vm3, 1.0, %v1351_v27  ;;  %v442_v42 = vpop.f32.mrf.mxu0 }
  0xf6   : > { %v550_v43 = vpack.c.bf16 %v976_v41, %v976_v41  ;;  %v1063_v44 = vpack.c.bf16 %v976_v41, %v975_v36  ;;  %vm479_vm4 = vcmp.ge.f32.partialorder %v442_v42, 3.0  ;;  %677 = vmatmul.bf16.vlgmr.msra.gmra.mxu1 %v605_v40 }
  0xf7   : > { %v969_v47 = vsel %vm479_vm4, 1.0, %v1351_v27 }
  0xf8   : > { %v598_v46 = vunpack.c.l.b16 %v550_v43  ;;  %1077 = vst [vmem:[%s1496_s21 + $0x20] sm:$0xff] %v1063_v44   ;;  %v543_v50 = vpack.c.bf16 %v969_v47, %v969_v47  ;;  %v493_v44 = vld [vmem:[#allocation8] sm:$0xff] }
  0xfa   : > { %v609_v48 = vpack.c.b16 %v598_v46, %v597_v45  ;;  %v591_v53 = vunpack.c.l.b16 %v543_v50  ;;  %v501_v50 = vld [vmem:[#allocation8 + $0x40] sm:$0xff] }
  0xfb   : > { %v462_v49 = vpop.f32.mrf.mxu2 }
  0xfc   : > { %697 = vmatmul.bf16.vlgmr.msra.gmra.mxu3 %v609_v48  ;;  %vm487_vm5 = vcmp.ge.f32.partialorder %v462_v49, 3.0 }
  0xfd   : > { %v444_v51 = vpop.f32.mrf.mxu0  ;;  %v977_v56 = vsel %vm487_vm5, 1.0, %v1351_v27 }
  0xfe   : > { %vm480_vm6 = vcmp.ge.f32.partialorder %v444_v51, 3.0  ;;  %v551_v59 = vpack.c.bf16 %v977_v56, %v977_v56 }
  0xff   : > { %v970_v52 = vsel %vm480_vm6, 1.0, %v1351_v27 }
 0x100   : > { %v544_v54 = vpack.c.bf16 %v970_v52, %v970_v52  ;;  %v1054_v55 = vpack.c.bf16 %v970_v52, %v969_v47  ;;  %v599_v1 = vunpack.c.l.b16 %v551_v59  ;;  %v494_v47 = vld [vmem:[#allocation8 + $0x8] sm:$0xff] }
 0x102   : > { %v592_v57 = vunpack.c.l.b16 %v544_v54  ;;  %1074 = vst [vmem:[%s1496_s21 + $0x8] sm:$0xff] %v1054_v55   ;;  %v502_v55 = vld [vmem:[#allocation8 + $0x48] sm:$0xff] }
 0x103   : > { %v464_v58 = vpop.f32.mrf.mxu2 }
 0x104   : > { %vm488_vm7 = vcmp.ge.f32.partialorder %v464_v58, 3.0  ;;  %v606_v60 = vpack.c.b16 %v592_v57, %v591_v53  ;;  %v496_v58 = vld [vmem:[#allocation8 + $0x18] sm:$0xff] }
 0x105   : > { %v978_v61 = vsel %vm488_vm7, 1.0, %v1351_v27  ;;  %v447_v62 = vpop.f32.mrf.mxu0 }
 0x106   : > { %v552_v63 = vpack.c.bf16 %v978_v61, %v978_v61  ;;  %v1066_v0 = vpack.c.bf16 %v978_v61, %v977_v56  ;;  %vm481_vm8 = vcmp.ge.f32.partialorder %v447_v62, 3.0  ;;  %682 = vmatmul.bf16.gmra.mxu1 %v606_v60  ;;  %v503_v61 = vld [vmem:[#allocation8 + $0x50] sm:$0xff] }
 0x107   : > { %v971_v3 = vsel %vm481_vm8, 1.0, %v1351_v27 }
 0x108   : > { %v600_v2 = vunpack.c.l.b16 %v552_v63  ;;  %1078 = vst [vmem:[%s1496_s21 + $0x28] sm:$0xff] %v1066_v0   ;;  %v545_v6 = vpack.c.bf16 %v971_v3, %v971_v3  ;;  %v497_v0 = vld [vmem:[#allocation8 + $0x20] sm:$0xff] }
 0x10a   : > { %v610_v4 = vpack.c.b16 %v600_v2, %v599_v1  ;;  %v593_v9 = vunpack.c.l.b16 %v545_v6  ;;  %v498_v6 = vld [vmem:[#allocation8 + $0x28] sm:$0xff] }
 0x10b   : > { %v467_v5 = vpop.f32.mrf.mxu2 }
 0x10c   : > { %702 = vmatmul.bf16.gmra.mxu3 %v610_v4  ;;  %vm489_vm9 = vcmp.ge.f32.partialorder %v467_v5, 3.0 }
 0x10d   : > { %v449_v7 = vpop.f32.mrf.mxu0  ;;  %v979_v12 = vsel %vm489_vm9, 1.0, %v1351_v27 }
 0x10e   : > { %vm482_vm10 = vcmp.ge.f32.partialorder %v449_v7, 3.0  ;;  %v553_v15 = vpack.c.bf16 %v979_v12, %v979_v12 }
 0x10f   : > { %v972_v8 = vsel %vm482_vm10, 1.0, %v1351_v27 }
 0x110   : > { %v546_v10 = vpack.c.bf16 %v972_v8, %v972_v8  ;;  %v1057_v11 = vpack.c.bf16 %v972_v8, %v971_v3  ;;  %v601_v21 = vunpack.c.l.b16 %v553_v15  ;;  %v504_v3 = vld [vmem:[#allocation8 + $0x58] sm:$0xff]  ;;  %v506_v15 = vld [vmem:[#allocation8 + $0x68] sm:$0xff] }
 0x112   : > { %v594_v13 = vunpack.c.l.b16 %v546_v10  ;;  %1075 = vst [vmem:[%s1496_s21 + $0x10] sm:$0xff] %v1057_v11  }
 0x113   : > { %v469_v14 = vpop.f32.mrf.mxu2 }
 0x114   : > { %vm490_vm11 = vcmp.ge.f32.partialorder %v469_v14, 3.0  ;;  %v607_v16 = vpack.c.b16 %v594_v13, %v593_v9  ;;  %v505_v9 = vld [vmem:[#allocation8 + $0x60] sm:$0xff] }
 0x115   : > { %v980_v17 = vsel %vm490_vm11, 1.0, %v1351_v27  ;;  %v452_v18 = vpop.f32.mrf.mxu0 }
 0x116   : > { %v554_v19 = vpack.c.bf16 %v980_v17, %v980_v17  ;;  %v1069_v20 = vpack.c.bf16 %v980_v17, %v979_v12  ;;  %vm483_vm12 = vcmp.ge.f32.partialorder %v452_v18, 3.0  ;;  %687 = vmatmul.bf16.gmra.mxu1 %v607_v16  ;;  %v499_v12 = vld [vmem:[#allocation8 + $0x30] sm:$0xff]  ;;  %v500_v18 = vld [vmem:[#allocation8 + $0x38] sm:$0xff] }
 0x117   : > { %v973_v23 = vsel %vm483_vm12, 1.0, %v1351_v27 }
 0x118   : > { %v602_v22 = vunpack.c.l.b16 %v554_v19  ;;  %1079 = vst [vmem:[%s1496_s21 + $0x30] sm:$0xff] %v1069_v20   ;;  %v547_v26 = vpack.c.bf16 %v973_v23, %v973_v23 }
 0x11a   : > { %v611_v24 = vpack.c.b16 %v602_v22, %v601_v21  ;;  %v595_v30 = vunpack.c.l.b16 %v547_v26  ;;  %v507_v21 = vld [vmem:[#allocation8 + $0x70] sm:$0xff] }
 0x11b   : > { %v472_v25 = vpop.f32.mrf.mxu2 }
 0x11c   : > { %707 = vmatmul.bf16.gmra.mxu3 %v611_v24  ;;  %vm491_vm13 = vcmp.ge.f32.partialorder %v472_v25, 3.0  ;;  %v508_v24 = vld [vmem:[#allocation8 + $0x78] sm:$0xff] }
 0x11d   : > { %v454_v28 = vpop.f32.mrf.mxu0  ;;  %v981_v33 = vsel %vm491_vm13, 1.0, %v1351_v27 }
 0x11e   : > { %vm484_vm14 = vcmp.ge.f32.partialorder %v454_v28, 3.0  ;;  %v555_v36 = vpack.c.bf16 %v981_v33, %v981_v33 }
 0x11f   : > { %v974_v29 = vsel %vm484_vm14, 1.0, %v1351_v27 }
 0x120   : > { %v548_v31 = vpack.c.bf16 %v974_v29, %v974_v29  ;;  %v1060_v32 = vpack.c.bf16 %v974_v29, %v973_v23  ;;  %v603_v41 = vunpack.c.l.b16 %v555_v36 }
 0x122   : > { %v596_v34 = vunpack.c.l.b16 %v548_v31  ;;  %1076 = vst [vmem:[%s1496_s21 + $0x18] sm:$0xff] %v1060_v32  }
 0x123   : > { %v474_v35 = vpop.f32.mrf.mxu2 }
 0x124   : > { %vm492_vm15 = vcmp.ge.f32.partialorder %v474_v35, 3.0  ;;  %v608_v37 = vpack.c.b16 %v596_v34, %v595_v30 }
 0x125   : > { %v982_v38 = vsel %vm492_vm15, 1.0, %v1351_v27  ;;  %v495_v27 = vld [vmem:[#allocation8 + $0x10] sm:$0xff] }
 0x126   : > { %v556_v39 = vpack.c.bf16 %v982_v38, %v982_v38  ;;  %v1072_v40 = vpack.c.bf16 %v982_v38, %v981_v33  ;;  %692 = vmatmul.bf16.gmra.mxu1 %v608_v37 }
 0x128   : > { %v604_v42 = vunpack.c.l.b16 %v556_v39  ;;  %1080 = vst [vmem:[%s1496_s21 + $0x38] sm:$0xff] %v1072_v40  }
 0x12a   : > { %v612_v43 = vpack.c.b16 %v604_v42, %v603_v41 }
 0x12c   : > { %712 = vmatmul.bf16.gmra.mxu3 %v612_v43 }
 0x173   : > { %v678_v45 = vpop.f32.mrf.mxu1 }
 0x174   : > { %v718_v46 = vadd.f32 %v678_v45, %v493_v44 }
 0x176   : > { %734 = vst [vmem:[#allocation8] sm:$0xff] %v718_v46 }
 0x17b   : > { %v680_v48 = vpop.f32.mrf.mxu1 }
 0x17c   : > { %v719_v49 = vadd.f32 %v680_v48, %v494_v47 }
 0x17e   : > { %735 = vst [vmem:[#allocation8 + $0x8] sm:$0xff] %v719_v49 }
 0x17f   : > { %v698_v51 = vpop.f32.mrf.mxu3 }
 0x180   : > { %v726_v52 = vadd.f32 %v698_v51, %v501_v50 }
 0x182   : > { %742 = vst [vmem:[#allocation8 + $0x40] sm:$0xff] %v726_v52 }
 0x183   : > { %v683_v53 = vpop.f32.mrf.mxu1 }
 0x184   : > { %v720_v54 = vadd.f32 %v683_v53, %v495_v27 }
 0x186   : > { %736 = vst [vmem:[#allocation8 + $0x10] sm:$0xff] %v720_v54 }
 0x187   : > { %v700_v56 = vpop.f32.mrf.mxu3 }
 0x188   : > { %v727_v57 = vadd.f32 %v700_v56, %v502_v55 }
 0x18a   : > { %743 = vst [vmem:[#allocation8 + $0x48] sm:$0xff] %v727_v57 }
 0x18b   : > { %v685_v59 = vpop.f32.mrf.mxu1 }
 0x18c   : > { %v721_v60 = vadd.f32 %v685_v59, %v496_v58 }
 0x18e   : > { %737 = vst [vmem:[#allocation8 + $0x18] sm:$0xff] %v721_v60 }
 0x18f   : > { %v703_v62 = vpop.f32.mrf.mxu3 }
 0x190   : > { %v728_v63 = vadd.f32 %v703_v62, %v503_v61 }
 0x192   : > { %744 = vst [vmem:[#allocation8 + $0x50] sm:$0xff] %v728_v63 }
 0x193   : > { %v688_v1 = vpop.f32.mrf.mxu1 }
 0x194   : > { %v722_v2 = vadd.f32 %v688_v1, %v497_v0 }
 0x196   : > { %738 = vst [vmem:[#allocation8 + $0x20] sm:$0xff] %v722_v2 }
 0x197   : > { %v705_v4 = vpop.f32.mrf.mxu3 }
 0x198   : > { %v729_v5 = vadd.f32 %v705_v4, %v504_v3 }
 0x19a   : > { %745 = vst [vmem:[#allocation8 + $0x58] sm:$0xff] %v729_v5 }
 0x19b   : > { %v690_v7 = vpop.f32.mrf.mxu1 }
 0x19c   : > { %v723_v8 = vadd.f32 %v690_v7, %v498_v6 }
 0x19e   : > { %739 = vst [vmem:[#allocation8 + $0x28] sm:$0xff] %v723_v8 }
 0x19f   : > { %v708_v10 = vpop.f32.mrf.mxu3 }
 0x1a0   : > { %v730_v11 = vadd.f32 %v708_v10, %v505_v9 }
 0x1a2   : > { %746 = vst [vmem:[#allocation8 + $0x60] sm:$0xff] %v730_v11 }
 0x1a3   : > { %v693_v13 = vpop.f32.mrf.mxu1 }
 0x1a4   : > { %v724_v14 = vadd.f32 %v693_v13, %v499_v12 }
 0x1a6   : > { %740 = vst [vmem:[#allocation8 + $0x30] sm:$0xff] %v724_v14 }
 0x1a7   : > { %v710_v16 = vpop.f32.mrf.mxu3 }
 0x1a8   : > { %v731_v17 = vadd.f32 %v710_v16, %v506_v15 }
 0x1aa   : > { %747 = vst [vmem:[#allocation8 + $0x68] sm:$0xff] %v731_v17 }
 0x1ab   : > { %v695_v19 = vpop.f32.mrf.mxu1 }
 0x1ac   : > { %v725_v20 = vadd.f32 %v695_v19, %v500_v18 }
 0x1ae   : > { %741 = vst [vmem:[#allocation8 + $0x38] sm:$0xff] %v725_v20 }
 0x1af   : > { %v713_v22 = vpop.f32.mrf.mxu3 }
 0x1b0   : > { %v732_v23 = vadd.f32 %v713_v22, %v507_v21 }
 0x1b2   : > { %748 = vst [vmem:[#allocation8 + $0x70] sm:$0xff] %v732_v23 }
 0x1b7   : > { %v715_v25 = vpop.f32.mrf.mxu3 }
 0x1b8   : > { %v733_v26 = vadd.f32 %v715_v25, %v508_v24 }
 0x1ba   : > { %749 = vst [vmem:[#allocation8 + $0x78] sm:$0xff] %v733_v26 }
 0x1bb   : > { %1102 = dma.vmem_to_hbm [thread:$0]  (%p1113_p1), %s782_s29, 2048, %s784_s4, [#allocation5], %s1353_s27, %s1353_s27, %s1354_s18  }
 0x1bc   : > { %1319 = dma.done.wait (%p1113_p1), [#allocation5], 2048  }
 0x1bd   : > { %1321 = vsyncadd (%p1113_p1), [#allocation5], 4294965248 }
 0x1be PF: > { %s20_s17 = sadd.s32 1, %s1344_s17   ;;  %s1551_s12 = smov %s1328_s13 }
 0x1bf   : > { %p17_p2 = scmp.ge.s32.totalorder %s20_s17, 4   ;;  %s1552_s13 = smov %s1332_s14 }
 0x1c0   : > { %s1553_s14 = smov %s1426_s24  ;;  %s1554_s15 = smov %s1340_s16 }
 0x1c1   : > { %s1555_s16 = smov %s1557_s19  ;;  %19 = sbr.rel (!%p17_p2) target bundleno = 7 (0x7), region = 92 }
 0x1c6   :  { %800 = vsyncpa [#allocation4], 1 }
 0x1c7   :  { %802 = vsyncpa [#allocation4 + $0x1], 1 }
 0x1c8   :  { %803 = vsyncpa [#allocation7], 1 }
 0x1c9   :  { %805 = vsyncpa [#allocation7 + $0x1], 1 }
 0x1ca   :  { %806 = vsyncpa [#allocation5], 1 }
 0x1cb   :  { %808 = vsyncpa [#allocation5 + $0x1], 1 }

</bundles_post_ra>
